<compile_context>
chip_gen: v7x
topology: tpu7x:2x2x1
jax: 0.10.0
libtpu: 0.0.40
codegen_flags: <defaults>
</compile_context>

<pallas_src>
import jax
import jax.numpy as jnp
from jax.experimental import pallas as pl
from jax.experimental.pallas import tpu as pltpu


def _round_up(x: int, m: int) -> int:
    return (x + m - 1) // m * m


def _affine_sigmoid_kernel(x_ref, w_ref, b_ref, o_ref):
    """o = sigmoid(x @ W_eff + b_eff).  x: (tm, K); W: (K, N); b: (1, N)."""
    # Cast in-kernel (keeps HBM traffic at the caller's dtype, math in f32 —
    # safe on v5e whose VPU/EUP have no bf16).
    x = x_ref[...].astype(jnp.float32)
    h = jnp.dot(x, w_ref[...], preferred_element_type=jnp.float32) + b_ref[...]
    o_ref[...] = jax.nn.sigmoid(h).astype(o_ref.dtype)


def fold_params(weights, biases):
    """Host-side (one-time) fold of 4 bias-affine layers into (W_eff, b_eff).

    weights[i] has shape (in_features, out_features) — i.e. the transpose of
    PyTorch nn.Linear storage; transpose once on the host when porting.
    """
    W_eff = weights[0].astype(jnp.float32)
    b_eff = biases[0].astype(jnp.float32)
    for W, b in zip(weights[1:], biases[1:]):
        W = W.astype(jnp.float32)
        b = b.astype(jnp.float32)
        b_eff = b_eff @ W + b
        W_eff = W_eff @ W
    return W_eff, b_eff.reshape(1, -1)


def net_forward(x, weights, biases, *, tm: int = 512):
    """Forward pass of `Net` as a single fused Pallas kernel.

    Args:
      x:        (batch, n_in) array (any float dtype).
      weights:  4 arrays of shape (in_features, out_features).
      biases:   4 arrays of shape (out_features,).
      tm:       max batch tile size (rows).
    Returns:
      (batch, n_out) array, same dtype as x.
    """
    assert len(weights) == 4 and len(biases) == 4
    M, K_in = x.shape
    n_out = weights[-1].shape[1]

    # --- Fold the 4 layers once on the host (tiny: (n_in, n_out)). ----------
    # TODO(synk): in a real model, hoist this fold out of the per-call path.
    W_eff, b_eff = fold_params(weights, biases)

    # --- Batch tiling.  Feature dims stay at their true widths. -------------
    tm_eff = max(8, min(tm, _round_up(M, 8)))
    if pl.cdiv(M, tm_eff) == 1 and M >= 16:
        # v7x: make sure there are >= 2 grid steps so both TensorCores work.
        tm_eff = _round_up(pl.cdiv(M, 2), 8)
    Mp = _round_up(M, tm_eff)

    # Pad only the batch dim (only when needed); zero rows are inert and
    # sliced away.  No feature-dim padding, no dtype change on the host.
    xp = x if Mp == M else jnp.zeros((Mp, K_in), x.dtype).at[:M].set(x)

    grid = (Mp // tm_eff,)

    itemsize = jnp.dtype(x.dtype).itemsize
    cost = pl.CostEstimate(
        flops=2 * Mp * K_in * n_out,
        transcendentals=Mp * n_out,
        bytes_accessed=Mp * K_in * itemsize + Mp * n_out * itemsize
                       + K_in * n_out * 4 + n_out * 4,
    )

    out_padded = pl.pallas_call(
        _affine_sigmoid_kernel,
        out_shape=jax.ShapeDtypeStruct((Mp, n_out), x.dtype),
        grid_spec=pltpu.PrefetchScalarGridSpec(
            num_scalar_prefetch=0,
            grid=grid,
            in_specs=[
                pl.BlockSpec((tm_eff, K_in), lambda i: (i, 0)),   # x tile
                pl.BlockSpec((K_in, n_out), lambda i: (0, 0)),    # W_eff (resident)
                pl.BlockSpec((1, n_out), lambda i: (0, 0)),       # b_eff (resident)
            ],
            out_specs=pl.BlockSpec((tm_eff, n_out), lambda i: (i, 0)),
        ),
        compiler_params=pltpu.CompilerParams(
            dimension_semantics=("parallel",),   # batch tiles across TCs (v7x)
        ),
        cost_estimate=cost,
    )(xp, W_eff, b_eff)

    return out_padded if Mp == M else out_padded[:M]


def _reference_forward(x, weights, biases):
    """Pure-JAX reference matching the PyTorch forward exactly (4 layers)."""
    h = x.astype(jnp.float32)
    for W, b in zip(weights, biases):
        h = h @ W.astype(jnp.float32) + b.astype(jnp.float32)
    return jax.nn.sigmoid(h).astype(x.dtype)


if __name__ == "__main__":
    # Small deterministic example consistent with the module: Net(n_in=16, n_out=3).
    batch, n_in, n_out = 8, 16, 3
    dims = [n_in, 5, 7, 7, n_out]

    key = jax.random.PRNGKey(0)
    keys = jax.random.split(key, 2 * (len(dims) - 1) + 1)

    x = jax.random.normal(keys[0], (batch, n_in), dtype=jnp.float32)

    # Weights stored as (in_features, out_features) = transpose of nn.Linear.
    weights, biases = [], []
    for li in range(len(dims) - 1):
        fan_in, fan_out = dims[li], dims[li + 1]
        bound = 1.0 / (fan_in ** 0.5)
        W = jax.random.uniform(keys[1 + 2 * li], (fan_in, fan_out),
                               minval=-bound, maxval=bound, dtype=jnp.float32)
        b = jax.random.uniform(keys[2 + 2 * li], (fan_out,),
                               minval=-bound, maxval=bound, dtype=jnp.float32)
        weights.append(W)
        biases.append(b)

    out = net_forward(x, weights, biases)
    out = jax.block_until_ready(out)

    ref = _reference_forward(x, weights, biases)
    ref = jax.block_until_ready(ref)

    assert out.shape == (batch, n_out), out.shape
    # Folding changes f32 rounding order slightly; well within tolerance.
    if not bool(jnp.allclose(out, ref, atol=2e-3, rtol=2e-3)):
        raise AssertionError(
            f"Pallas output differs from reference: max abs err = "
            f"{float(jnp.max(jnp.abs(out - ref)))}")

    print("KERNEL_OK")
</pallas_src>

<mosaic_0001>
module attributes {stable_mosaic.version = 11 : i64} {
  func.func @_affine_sigmoid_kernel(%arg0: i32, %arg1: memref<8x16xf32, #tpu.memory_space<vmem>>, %arg2: memref<16x3xf32, #tpu.memory_space<vmem>>, %arg3: memref<1x3xf32, #tpu.memory_space<vmem>>, %arg4: memref<8x3xf32, #tpu.memory_space<vmem>>) attributes {dimension_semantics = [#tpu.dimension_semantics<parallel>], iteration_bounds = array<i64: 1>, scalar_prefetch = 0 : i64, scratch_operands = 0 : i64, tpu.core_type = #tpu.core_type<tc>, window_params = [{transform_indices = @transform_0, window_bounds = array<i64: 8, 16>}, {pipeline_mode = #tpu.pipeline_mode<synchronous>, transform_indices = @transform_1, window_bounds = array<i64: 16, 3>}, {pipeline_mode = #tpu.pipeline_mode<synchronous>, transform_indices = @transform_2, window_bounds = array<i64: 1, 3>}, {transform_indices = @transform_3, window_bounds = array<i64: 8, 3>}]} {
    %c0 = arith.constant 0 : index
    %c0_0 = arith.constant 0 : index
    %0 = vector.load %arg1[%c0, %c0_0] : memref<8x16xf32, #tpu.memory_space<vmem>>, vector<8x16xf32>
    %c0_1 = arith.constant 0 : index
    %c0_2 = arith.constant 0 : index
    %1 = vector.load %arg2[%c0_1, %c0_2] : memref<16x3xf32, #tpu.memory_space<vmem>>, vector<16x3xf32>
    %cst = arith.constant dense<0.000000e+00> : vector<8x3xf32>
    %2 = tpu.matmul %0, %1, %cst {dimension_numbers = #tpu.dot_dimension_numbers<[1], [0], [0], [1], [0, 0, 1, 1], [], []>} : vector<8x16xf32>, vector<16x3xf32>, vector<8x3xf32> -> vector<8x3xf32>
    %c0_3 = arith.constant 0 : index
    %c0_4 = arith.constant 0 : index
    %3 = vector.load %arg3[%c0_3, %c0_4] : memref<1x3xf32, #tpu.memory_space<vmem>>, vector<1x3xf32>
    %4 = vector.broadcast %3 : vector<1x3xf32> to vector<8x3xf32>
    %5 = arith.addf %2, %4 : vector<8x3xf32>
    %6 = arith.negf %5 : vector<8x3xf32>
    %7 = math.exp %6 : vector<8x3xf32>
    %cst_5 = arith.constant 1.000000e+00 : f32
    %8 = vector.broadcast %cst_5 : f32 to vector<8x3xf32>
    %9 = arith.addf %8, %7 : vector<8x3xf32>
    %10 = arith.divf %8, %9 : vector<8x3xf32>
    %c0_6 = arith.constant 0 : index
    %c0_7 = arith.constant 0 : index
    %11 = vector.load %arg4[%c0_6, %c0_7] : memref<8x3xf32, #tpu.memory_space<vmem>>, vector<8x3xf32>
    tpu.vector_store %arg4[%c0_6, %c0_7], %10 {strides = array<i32>} : memref<8x3xf32, #tpu.memory_space<vmem>>, vector<8x3xf32>,
    return
  }
  func.func @transform_0(%arg0: i32) -> (i32, i32) {
    %c0_i32 = arith.constant 0 : i32
    %c0_i32_0 = arith.constant 0 : i32
    return %arg0, %c0_i32 : i32, i32
  }
  func.func @transform_1(%arg0: i32) -> (i32, i32) {
    %c0_i32 = arith.constant 0 : i32
    %c0_i32_0 = arith.constant 0 : i32
    %c0_i32_1 = arith.constant 0 : i32
    return %c0_i32, %c0_i32_0 : i32, i32
  }
  func.func @transform_2(%arg0: i32) -> (i32, i32) {
    %c0_i32 = arith.constant 0 : i32
    %c0_i32_0 = arith.constant 0 : i32
    %c0_i32_1 = arith.constant 0 : i32
    return %c0_i32, %c0_i32_0 : i32, i32
  }
  func.func @transform_3(%arg0: i32) -> (i32, i32) {
    %c0_i32 = arith.constant 0 : i32
    %c0_i32_0 = arith.constant 0 : i32
    return %arg0, %c0_i32 : i32, i32
  }
}

</mosaic_0001>

<bundles_post_ra>
// kernel: tpu_custom_call.1
= control target key start
LH: loop header
LB: loop body
LE: loop exit
PB: predicated region body
PF: predicated region fallthrough
CT: control target
= control target key end

     0   :  { %v133_v0 = vmov 0.0|0.0   ;;  %vm134_vm0 = vmmov 0   ;;  %v135_v3 = vmov 0.0   ;;  %vm24_vm1 = vcmask 130048   ;;  %s171_s1 = inlined_call_operand.vmem [shape: f32[16,3], index: 1, kind: input, shape index: {}]   ;;  %s172_s0 = inlined_call_operand.vmem [shape: f32[8,16], index: 0, kind: input, shape index: {}]   ;;  %s173_s2 = inlined_call_operand.vmem [shape: f32[1,3], index: 2, kind: input, shape index: {}]   ;;  %s174_s3 = inlined_call_operand.vmem [shape: f32[8,3], index: 3, kind: output, shape index: {}]  }
   0x1   :  { %123 = vmatprep.subr.bf16.mxu0 %v133_v0  ;;  %v15_v1 = vld [vmem:[%s171_s1] sm:$0xff]  ;;  %v16_v2 = vld [vmem:[%s171_s1 + $0x8] sm:$0xff]  ;;  %120 = vmatprep.mubr.msk.f32.mxu0 %vm134_vm0, %v135_v3  ;;  %vm104_vm2 = vcmask 23552  }
   0x2   :  { %v124_v4 = vpack.c.bf16 %v16_v2, %v15_v1  ;;  %v14_v5 = vld [vmem:[%s172_s0] sm:$0xff] }
   0x3   :  { %v110_v6 = vld [vmem:[%s173_s2] ss:$0 sm:$0xff] }
   0x4   :  { %125 = vmatpush3.bf16.msra.mxu0 %v124_v4 }
   0x7   :  { %121 = vmatmul.mubr.msk.f32.vlgmr.msra.gmra.mrb[0].mxu0 %vm24_vm1, %v14_v5 }
  0xda   :  { %v94_v7 = vpop.f32.mrb[0].mxu0 }
  0xdb   :  { %v95_v8 = vadd.f32 %v110_v6, %v94_v7  ;;  %v122_v9 = vpop.f32.mrb[1].mxu0 }
  0xdd   :  { %v112_v10 = vmul.f32 -1.442695, %v95_v8 }
  0xdf   :  { %129 = vpow2.f32 %v112_v10 }
  0xe9   :  { %v130_v11 = vpop.eup %129 }
  0xea   :  { %v101_v12 = vadd.f32 1.0, %v130_v11 }
  0xec   :  { %131 = vrcp.f32 %v101_v12 }
  0xf6   :  { %v132_v13 = vpop.eup %131 }
  0xf7   :  { %105 = vst.msk [vmem:[%s174_s3] sm:$0xff] %vm104_vm2, %v132_v13 }

</bundles_post_ra>
